<compile_context>
chip_gen: v5e
topology: v5e:2x2
jax: 0.10.0
libtpu: 0.0.40
codegen_flags: <defaults>
</compile_context>

<pallas_src>
import functools

import jax
import jax.numpy as jnp
from jax.experimental import pallas as pl
from jax.experimental.pallas import tpu as pltpu

LANE = 128  # TPU vreg lane width


def gnn_kernel(adj_ref, x_ref, w1_ref, b1_ref, w2_ref, b2_ref, out_ref, *,
               num_classes):
    # Single VMEM->vreg load of each operand; Â is reused by both aggregations.
    adj = adj_ref[...]          # bf16 [N, N]
    x = x_ref[...]              # bf16 [N, F]
    w1 = w1_ref[...]            # bf16 [F, H]
    w2 = w2_ref[...]            # bf16 [H, Cp]  (class dim zero-padded to 128)
    b1 = b1_ref[...]            # f32  [1, H]
    b2 = b2_ref[...]            # f32  [1, Cp]

    # ---- layer 1: GCNConv(F -> H), then ReLU (bf16 matmuls, f32 accumulate) ----
    xw = jnp.dot(x, w1, preferred_element_type=jnp.float32)
    h1 = jnp.dot(adj, xw.astype(jnp.bfloat16),
                 preferred_element_type=jnp.float32) + b1
    h1 = jnp.maximum(h1, 0.0)                     # F.relu

    # ---- layer 2: GCNConv(H -> C) ----
    hw = jnp.dot(h1.astype(jnp.bfloat16), w2,
                 preferred_element_type=jnp.float32)
    h2 = jnp.dot(adj, hw.astype(jnp.bfloat16),
                 preferred_element_type=jnp.float32) + b2

    # ---- log_softmax over the (lane-padded) class dim ----
    # Padded lanes (>= num_classes) are excluded from the max and the sum, so
    # the real class columns hold exactly log_softmax(h2[:, :C], dim=1).
    lane = jax.lax.broadcasted_iota(jnp.int32, h2.shape, dimension=1)
    valid = lane < num_classes
    neg = jnp.float32(-3.0e38)
    h2m = jnp.where(valid, h2, neg)
    m = jnp.max(h2m, axis=1, keepdims=True)
    z = h2m - m
    p = jnp.where(valid, jnp.exp(z), 0.0)
    lse = jnp.log(jnp.sum(p, axis=1, keepdims=True))
    out_ref[...] = z - lse                         # lane-dense (N, 128) store


def gnn_forward(x, adj_norm, w1, b1, w2, b2):
    N, _ = x.shape
    H = w1.shape[1]
    C = w2.shape[1]
    c_pad = max(LANE, ((C + LANE - 1) // LANE) * LANE)

    # bf16 matmul operands (MXU-native; halves VMEM for the dense Â);
    # biases stay f32 so bias-add / ReLU / log-softmax are full precision.
    adj_bf = adj_norm.astype(jnp.bfloat16)
    x_bf = x.astype(jnp.bfloat16)
    w1_bf = w1.astype(jnp.bfloat16)
    # Zero-pad W2 / b2 along the class dim so the kernel's output store is
    # lane-dense (full 128-lane vst instead of a masked 2-lane partial store).
    w2_p = jnp.zeros((H, c_pad), jnp.bfloat16).at[:, :C].set(
        w2.astype(jnp.bfloat16))
    b2_p = jnp.zeros((1, c_pad), jnp.float32).at[:, :C].set(
        b2.astype(jnp.float32))
    b1_f = b1.astype(jnp.float32)

    vmem = pl.BlockSpec(memory_space=pltpu.MemorySpace.VMEM)
    out_padded = pl.pallas_call(
        functools.partial(gnn_kernel, num_classes=C),
        out_shape=jax.ShapeDtypeStruct((N, c_pad), jnp.float32),
        in_specs=[vmem] * 6,
        out_specs=vmem,
    )(adj_bf, x_bf, w1_bf, b1_f, w2_p, b2_p)
    return out_padded[:, :C]


def build_normalized_adj(key, n):
    """Random symmetric graph -> D^{-1/2} (A + I) D^{-1/2} (dense, float32)."""
    a = (jax.random.uniform(key, (n, n)) < 0.1).astype(jnp.float32)
    a = jnp.maximum(a, a.T)                          # symmetric
    a = a.at[jnp.arange(n), jnp.arange(n)].set(1.0)  # add self-loops
    deg = jnp.sum(a, axis=1)
    d_inv_sqrt = 1.0 / jnp.sqrt(deg)
    return a * d_inv_sqrt[:, None] * d_inv_sqrt[None, :]


if __name__ == "__main__":
    # small shapes consistent with the module:
    #   N nodes, num_features=32, hidden=16, num_classes=2 (DGraph)
    N, F, H, C = 64, 32, 16, 2

    key = jax.random.PRNGKey(0)
    k_adj, k_x, k_w1, k_b1, k_w2, k_b2 = jax.random.split(key, 6)

    adj_norm = build_normalized_adj(k_adj, N)
    x = jax.random.normal(k_x, (N, F), dtype=jnp.float32)

    # deterministic (Glorot-ish) parameter init
    w1 = jax.random.normal(k_w1, (F, H), dtype=jnp.float32) * (1.0 / jnp.sqrt(F))
    b1 = jax.random.normal(k_b1, (1, H), dtype=jnp.float32) * 0.01
    w2 = jax.random.normal(k_w2, (H, C), dtype=jnp.float32) * (1.0 / jnp.sqrt(H))
    b2 = jax.random.normal(k_b2, (1, C), dtype=jnp.float32) * 0.01

    out = gnn_forward(x, adj_norm, w1, b1, w2, b2)
    jax.block_until_ready(out)
    assert out.shape == (N, C)

    # (1) tight check against a reference that mirrors the kernel's mixed
    #     precision (bf16 matmul operands, f32 accumulation).
    def mm(a, b):
        return jnp.dot(a.astype(jnp.bfloat16), b.astype(jnp.bfloat16),
                       preferred_element_type=jnp.float32)

    h1_e = jnp.maximum(mm(adj_norm, mm(x, w1)) + b1, 0.0)
    h2_e = mm(adj_norm, mm(h1_e, w2)) + b2
    ref_bf16 = jax.nn.log_softmax(h2_e, axis=1)
    assert jnp.allclose(out, ref_bf16, atol=1e-3, rtol=1e-3)

    # (2) loose check against the pure-f32 reference (bf16 operand rounding
    #     is the only difference).
    h1_ref = jnp.maximum(adj_norm @ (x @ w1) + b1, 0.0)
    h2_ref = adj_norm @ (h1_ref @ w2) + b2
    ref_f32 = jax.nn.log_softmax(h2_ref, axis=1)
    assert jnp.allclose(out, ref_f32, atol=5e-2, rtol=5e-2)

    print("KERNEL_OK")
</pallas_src>

<mosaic_0001>
module attributes {stable_mosaic.version = 11 : i64} {
  func.func @gnn_kernel(%arg0: memref<64x64xbf16, #tpu.memory_space<vmem>>, %arg1: memref<64x32xbf16, #tpu.memory_space<vmem>>, %arg2: memref<32x16xbf16, #tpu.memory_space<vmem>>, %arg3: memref<1x16xf32, #tpu.memory_space<vmem>>, %arg4: memref<16x128xbf16, #tpu.memory_space<vmem>>, %arg5: memref<1x128xf32, #tpu.memory_space<vmem>>, %arg6: memref<64x128xf32, #tpu.memory_space<vmem>>) attributes {dimension_semantics = [], scalar_prefetch = 0 : i64, scratch_operands = 0 : i64, tpu.core_type = #tpu.core_type<tc>} {
    %c0 = arith.constant 0 : index
    %c0_0 = arith.constant 0 : index
    %0 = vector.load %arg0[%c0, %c0_0] : memref<64x64xbf16, #tpu.memory_space<vmem>>, vector<64x64xbf16>
    %c0_1 = arith.constant 0 : index
    %c0_2 = arith.constant 0 : index
    %1 = vector.load %arg1[%c0_1, %c0_2] : memref<64x32xbf16, #tpu.memory_space<vmem>>, vector<64x32xbf16>
    %c0_3 = arith.constant 0 : index
    %c0_4 = arith.constant 0 : index
    %2 = vector.load %arg2[%c0_3, %c0_4] : memref<32x16xbf16, #tpu.memory_space<vmem>>, vector<32x16xbf16>
    %c0_5 = arith.constant 0 : index
    %c0_6 = arith.constant 0 : index
    %3 = vector.load %arg4[%c0_5, %c0_6] : memref<16x128xbf16, #tpu.memory_space<vmem>>, vector<16x128xbf16>
    %c0_7 = arith.constant 0 : index
    %c0_8 = arith.constant 0 : index
    %4 = vector.load %arg3[%c0_7, %c0_8] : memref<1x16xf32, #tpu.memory_space<vmem>>, vector<1x16xf32>
    %c0_9 = arith.constant 0 : index
    %c0_10 = arith.constant 0 : index
    %5 = vector.load %arg5[%c0_9, %c0_10] : memref<1x128xf32, #tpu.memory_space<vmem>>, vector<1x128xf32>
    %cst = arith.constant dense<0.000000e+00> : vector<64x16xf32>
    %6 = tpu.matmul %1, %2, %cst {dimension_numbers = #tpu.dot_dimension_numbers<[1], [0], [0], [1], [0, 0, 1, 1], [], []>} : vector<64x32xbf16>, vector<32x16xbf16>, vector<64x16xf32> -> vector<64x16xf32>
    %7 = arith.truncf %6 : vector<64x16xf32> to vector<64x16xbf16>
    %cst_11 = arith.constant dense<0.000000e+00> : vector<64x16xf32>
    %8 = tpu.matmul %0, %7, %cst_11 {dimension_numbers = #tpu.dot_dimension_numbers<[1], [0], [0], [1], [0, 0, 1, 1], [], []>} : vector<64x64xbf16>, vector<64x16xbf16>, vector<64x16xf32> -> vector<64x16xf32>
    %9 = vector.broadcast %4 : vector<1x16xf32> to vector<64x16xf32>
    %10 = arith.addf %8, %9 : vector<64x16xf32>
    %cst_12 = arith.constant 0.000000e+00 : f32
    %11 = vector.broadcast %cst_12 : f32 to vector<64x16xf32>
    %12 = arith.maximumf %10, %11 : vector<64x16xf32>
    %13 = arith.truncf %12 : vector<64x16xf32> to vector<64x16xbf16>
    %cst_13 = arith.constant dense<0.000000e+00> : vector<64x128xf32>
    %14 = tpu.matmul %13, %3, %cst_13 {dimension_numbers = #tpu.dot_dimension_numbers<[1], [0], [0], [1], [0, 0, 1, 1], [], []>} : vector<64x16xbf16>, vector<16x128xbf16>, vector<64x128xf32> -> vector<64x128xf32>
    %15 = arith.truncf %14 : vector<64x128xf32> to vector<64x128xbf16>
    %cst_14 = arith.constant dense<0.000000e+00> : vector<64x128xf32>
    %16 = tpu.matmul %0, %15, %cst_14 {dimension_numbers = #tpu.dot_dimension_numbers<[1], [0], [0], [1], [0, 0, 1, 1], [], []>} : vector<64x64xbf16>, vector<64x128xbf16>, vector<64x128xf32> -> vector<64x128xf32>
    %17 = vector.broadcast %5 : vector<1x128xf32> to vector<64x128xf32>
    %18 = arith.addf %16, %17 : vector<64x128xf32>
    %19 = tpu.iota {dimensions = array<i32: 1>} : vector<64x128xi32>
    %c2_i32 = arith.constant 2 : i32
    %20 = vector.broadcast %c2_i32 : i32 to vector<64x128xi32>
    %21 = arith.cmpi slt, %19, %20 : vector<64x128xi32>
    %cst_15 = arith.constant -3.000000e+38 : f32
    %22 = vector.broadcast %cst_15 : f32 to vector<64x128xf32>
    %23 = arith.select %21, %18, %22 : vector<64x128xi1>, vector<64x128xf32>
    %cst_16 = arith.constant dense<0xFF800000> : vector<64xf32>
    %24 = vector.multi_reduction <maximumf>, %23, %cst_16 [1] : vector<64x128xf32> to vector<64xf32>
    %25 = vector.shape_cast %24 : vector<64xf32> to vector<64x1xf32>
    %26 = vector.broadcast %25 : vector<64x1xf32> to vector<64x128xf32>
    %27 = arith.subf %23, %26 : vector<64x128xf32>
    %28 = math.exp %27 : vector<64x128xf32>
    %cst_17 = arith.constant 0.000000e+00 : f32
    %29 = vector.broadcast %cst_17 : f32 to vector<64x128xf32>
    %30 = arith.select %21, %28, %29 : vector<64x128xi1>, vector<64x128xf32>
    %cst_18 = arith.constant dense<0.000000e+00> : vector<64xf32>
    %31 = vector.multi_reduction <add>, %30, %cst_18 [1] : vector<64x128xf32> to vector<64xf32>
    %32 = vector.shape_cast %31 : vector<64xf32> to vector<64x1xf32>
    %33 = math.log %32 : vector<64x1xf32>
    %34 = vector.broadcast %33 : vector<64x1xf32> to vector<64x128xf32>
    %35 = arith.subf %27, %34 : vector<64x128xf32>
    %c0_19 = arith.constant 0 : index
    %c0_20 = arith.constant 0 : index
    %36 = vector.load %arg6[%c0_19, %c0_20] : memref<64x128xf32, #tpu.memory_space<vmem>>, vector<64x128xf32>
    tpu.vector_store %arg6[%c0_19, %c0_20], %35 {strides = array<i32>} : memref<64x128xf32, #tpu.memory_space<vmem>>, vector<64x128xf32>,
    return
  }
}

</mosaic_0001>

<bundles_post_ra>
// kernel: tpu_custom_call.1
= control target key start
LH: loop header
LB: loop body
LE: loop exit
PB: predicated region body
PF: predicated region fallthrough
CT: control target
= control target key end

     0   :  { %s682_s0 = inlined_call_operand.vmem [shape: bf16[64,64], index: 0, kind: input, shape index: {}]   ;;  %s683_s1 = inlined_call_operand.vmem [shape: bf16[64,32], index: 1, kind: input, shape index: {}]   ;;  %s684_s2 = inlined_call_operand.vmem [shape: bf16[32,16], index: 2, kind: input, shape index: {}]   ;;  %s685_s3 = inlined_call_operand.vmem [shape: f32[1,16], index: 3, kind: input, shape index: {}]   ;;  %s686_s4 = inlined_call_operand.vmem [shape: bf16[16,128], index: 4, kind: input, shape index: {}]   ;;  %s687_s5 = inlined_call_operand.vmem [shape: f32[1,128], index: 5, kind: input, shape index: {}]   ;;  %s688_s6 = inlined_call_operand.hbm [shape: f32[64,128], index: 6, kind: output, shape index: {}]  }
   0x1   :  { %v482_v0 = vld [vmem:[%s684_s2 + $0x8] sm:$0xff]  ;;  %v481_v1 = vld [vmem:[%s684_s2] sm:$0xff] }
   0x2   :  { %100 = vmatpush.bf16.msra.mxu0 %v482_v0 }
   0x3   :  { %11 = vsyncpa [#allocation3], 0  ;;  %v477_v2 = vld [vmem:[%s683_s1] sm:$0xff]  ;;  %vm81_vm0 = vcmask 261120   ;;  %v478_v3 = vld [vmem:[%s683_s1 + $0x8] sm:$0xff]  ;;  %vm150_vm1 = vcmask 523264   ;;  %v288_v0 = vlaneseq }
   0x4   :  { %v479_v4 = vld [vmem:[%s683_s1 + $0x10] sm:$0xff]  ;;  %v480_v5 = vld [vmem:[%s683_s1 + $0x18] sm:$0xff]  ;;  %v473_v18 = vld [vmem:[%s682_s0] sm:$0xff]  ;;  %vm210_vm2 = vcmask 130048   ;;  %s401_s21 = sshll.u32 %s688_s6, 4  ;;  %s548_s22 = smov 128   ;;  %s402_s21 = int_to_ptr.hbm [resolvable:$true] %s401_s21 }
   0x5   :  { %v474_v19 = vld [vmem:[%s682_s0 + $0x8] sm:$0xff]  ;;  %v475_v20 = vld [vmem:[%s682_s0 + $0x10] sm:$0xff]  ;;  %v476_v21 = vld [vmem:[%s682_s0 + $0x18] sm:$0xff]  ;;  %s549_s23 = smov 8  }
   0x6   :  { %101 = vmatpush.bf16.msra.mxu0 %v481_v1  ;;  %v483_v22 = vld [vmem:[%s686_s4] sm:$0xff]  ;;  %v633_v1 = vand.u32 127, %v288_v0  ;;  %s547_s4 = smov [#allocation2]  }
   0x7   :  { %230 = vmatpush.bf16.msra.mxu2 %v483_v22  ;;  %v487_v24 = vld [vmem:[%s685_s3] ss:$0 sm:$0xff] }
   0x8   :  { %vm290_vm3 = vcmp.lt.s32.totalorder %v633_v1, 2 }
   0x9   :  { %437 = vmatmul.msk.bf16.vlgmr.msra.gmra.mxu0 %vm81_vm0, %v477_v2  ;;  %v488_v2 = vld [vmem:[%s687_s5] ss:$0 sm:$0xff]  ;;  %s399_s5 = sshll.u32 %s547_s4, 4  ;;  %s400_s5 = int_to_ptr.vmem [resolvable:$true] %s399_s5 }
  0x19   :  { %438 = vmatmul.msk.bf16.gmra.mxu0 %vm81_vm0, %v478_v3 }
  0x29   :  { %439 = vmatmul.msk.bf16.gmra.mxu0 %vm81_vm0, %v479_v4 }
  0x39   :  { %440 = vmatmul.msk.bf16.gmra.mxu0 %vm81_vm0, %v480_v5 }
  0x86   :  { %v103_v6 = vpop.f32.mrf.mxu0 }
  0x8e   :  { %v105_v7 = vpop.f32.mrf.mxu0 }
  0x8f   :  { %v123_v17 = vpack.c.bf16 %v105_v7, %v103_v6 }
  0x96   :  { %v108_v8 = vpop.f32.mrf.mxu0 }
  0x9e   :  { %v110_v9 = vpop.f32.mrf.mxu0 }
  0x9f   :  { %v124_v16 = vpack.c.bf16 %v110_v9, %v108_v8 }
  0xa6   :  { %v113_v10 = vpop.f32.mrf.mxu0 }
  0xae   :  { %v115_v11 = vpop.f32.mrf.mxu0 }
  0xaf   :  { %v125_v15 = vpack.c.bf16 %v115_v11, %v113_v10 }
  0xb6   :  { %v118_v12 = vpop.f32.mrf.mxu0 }
  0xbe   :  { %v120_v13 = vpop.f32.mrf.mxu0 }
  0xbf   :  { %v126_v14 = vpack.c.bf16 %v120_v13, %v118_v12 }
  0xc1   :  { %167 = vmatpush.bf16.msra.mxu1 %v126_v14 }
  0xc5   :  { %168 = vmatpush.bf16.msra.mxu1 %v125_v15 }
  0xc9   :  { %169 = vmatpush.bf16.msra.mxu1 %v124_v16 }
  0xcd   :  { %170 = vmatpush.bf16.msra.mxu1 %v123_v17 }
  0xd0   :  { %457 = vmatmul.msk.bf16.vlgmr.msra.gmra.mxu1 %vm150_vm1, %v473_v18 }
  0xe0   :  { %458 = vmatmul.msk.bf16.gmra.mxu1 %vm150_vm1, %v474_v19 }
  0xf0   :  { %459 = vmatmul.msk.bf16.gmra.mxu1 %vm150_vm1, %v475_v20 }
 0x100   :  { %460 = vmatmul.msk.bf16.gmra.mxu1 %vm150_vm1, %v476_v21 }
 0x14d   :  { %v172_v23 = vpop.f32.mrf.mxu1 }
 0x14e   :  { %v173_v25 = vadd.f32 %v487_v24, %v172_v23 }
 0x150   :  { %v192_v28 = vmax.f32 %v173_v25, 0.0 }
 0x155   :  { %v174_v26 = vpop.f32.mrf.mxu1 }
 0x156   :  { %v175_v27 = vadd.f32 %v487_v24, %v174_v26 }
 0x158   :  { %v193_v29 = vmax.f32 %v175_v27, 0.0 }
 0x15a   :  { %v200_v30 = vpack.c.bf16 %v193_v29, %v192_v28 }
 0x15c   :  { %465 = vmatmul.msk.bf16.vlgmr.msra.gmra.mxu2 %vm210_vm2, %v200_v30 }
 0x15d   :  { %v177_v31 = vpop.f32.mrf.mxu1 }
 0x15e   :  { %v178_v32 = vadd.f32 %v487_v24, %v177_v31 }
 0x160   :  { %v194_v35 = vmax.f32 %v178_v32, 0.0 }
 0x165   :  { %v179_v33 = vpop.f32.mrf.mxu1 }
 0x166   :  { %v180_v34 = vadd.f32 %v487_v24, %v179_v33 }
 0x168   :  { %v195_v36 = vmax.f32 %v180_v34, 0.0 }
 0x16a   :  { %v201_v37 = vpack.c.bf16 %v195_v36, %v194_v35 }
 0x16c   :  { %466 = vmatmul.msk.bf16.gmra.mxu2 %vm210_vm2, %v201_v37 }
 0x16d   :  { %v182_v38 = vpop.f32.mrf.mxu1 }
 0x16e   :  { %v183_v39 = vadd.f32 %v487_v24, %v182_v38 }
 0x170   :  { %v196_v42 = vmax.f32 %v183_v39, 0.0 }
 0x175   :  { %v184_v40 = vpop.f32.mrf.mxu1 }
 0x176   :  { %v185_v41 = vadd.f32 %v487_v24, %v184_v40 }
 0x178   :  { %v197_v43 = vmax.f32 %v185_v41, 0.0 }
 0x17a   :  { %v202_v44 = vpack.c.bf16 %v197_v43, %v196_v42 }
 0x17c   :  { %467 = vmatmul.msk.bf16.gmra.mxu2 %vm210_vm2, %v202_v44 }
 0x17d   :  { %v187_v45 = vpop.f32.mrf.mxu1 }
 0x17e   :  { %v188_v46 = vadd.f32 %v487_v24, %v187_v45 }
 0x180   :  { %v198_v49 = vmax.f32 %v188_v46, 0.0 }
 0x185   :  { %v189_v47 = vpop.f32.mrf.mxu1 }
 0x186   :  { %v190_v48 = vadd.f32 %v487_v24, %v189_v47 }
 0x188   :  { %v199_v50 = vmax.f32 %v190_v48, 0.0 }
 0x18a   :  { %v203_v51 = vpack.c.bf16 %v199_v50, %v198_v49 }
 0x18c   :  { %468 = vmatmul.msk.bf16.gmra.mxu2 %vm210_vm2, %v203_v51 }
 0x1df   :  { %v232_v52 = vpop.f32.mrf.mxu2 }
 0x1e7   :  { %v234_v53 = vpop.f32.mrf.mxu2 }
 0x1e8   :  { %v252_v63 = vpack.c.bf16 %v234_v53, %v232_v52 }
 0x1ef   :  { %v237_v54 = vpop.f32.mrf.mxu2 }
 0x1f7   :  { %v239_v55 = vpop.f32.mrf.mxu2 }
 0x1f8   :  { %v253_v62 = vpack.c.bf16 %v239_v55, %v237_v54 }
 0x1ff   :  { %v242_v56 = vpop.f32.mrf.mxu2 }
 0x207   :  { %v244_v57 = vpop.f32.mrf.mxu2 }
 0x208   :  { %v254_v61 = vpack.c.bf16 %v244_v57, %v242_v56 }
 0x20f   :  { %v247_v58 = vpop.f32.mrf.mxu2 }
 0x217   :  { %v249_v59 = vpop.f32.mrf.mxu2 }
 0x218   :  { %v255_v60 = vpack.c.bf16 %v249_v59, %v247_v58 }
 0x21a   :  { %263 = vmatpush.bf16.msra.mxu3 %v255_v60 }
 0x21e   :  { %264 = vmatpush.bf16.msra.mxu3 %v254_v61 }
 0x222   :  { %265 = vmatpush.bf16.msra.mxu3 %v253_v62 }
 0x226   :  { %266 = vmatpush.bf16.msra.mxu3 %v252_v63 }
 0x229   :  { %469 = vmatmul.msk.bf16.vlgmr.msra.gmra.mxu3 %vm150_vm1, %v473_v18 }
 0x239   :  { %470 = vmatmul.msk.bf16.gmra.mxu3 %vm150_vm1, %v474_v19 }
 0x249   :  { %471 = vmatmul.msk.bf16.gmra.mxu3 %vm150_vm1, %v475_v20 }
 0x259   :  { %472 = vmatmul.msk.bf16.gmra.mxu3 %vm150_vm1, %v476_v21 }
 0x2ac   :  { %v268_v3 = vpop.f32.mrf.mxu3 }
 0x2ad   :  { %v269_v4 = vadd.f32 %v488_v2, %v268_v3 }
 0x2af   :  { %v291_v5 = vsel %vm290_vm3, %v269_v4, -3e+38 }
 0x2b0   :  { %299 = vmax.xlane.f32.xlu0 %v291_v5 }
 0x2b4   :  { %v270_v6 = vpop.f32.mrf.mxu3 }
 0x2b5   :  { %v271_v7 = vadd.f32 %v488_v2, %v270_v6 }
 0x2b7   :  { %v292_v8 = vsel %vm290_vm3, %v271_v7, -3e+38 }
 0x2b8   :  { %301 = vmax.xlane.f32.xlu0 %v292_v8 }
 0x2bc   :  { %v273_v9 = vpop.f32.mrf.mxu3 }
 0x2bd   :  { %v274_v10 = vadd.f32 %v488_v2, %v273_v9 }
 0x2bf   :  { %v293_v11 = vsel %vm290_vm3, %v274_v10, -3e+38 }
 0x2c0   :  { %303 = vmax.xlane.f32.xlu1 %v293_v11 }
 0x2c4   :  { %v275_v12 = vpop.f32.mrf.mxu3 }
 0x2c5   :  { %v276_v13 = vadd.f32 %v488_v2, %v275_v12 }
 0x2c7   :  { %v294_v14 = vsel %vm290_vm3, %v276_v13, -3e+38 }
 0x2c8   :  { %305 = vmax.xlane.f32.xlu1 %v294_v14 }
 0x2cc   :  { %v278_v15 = vpop.f32.mrf.mxu3 }
 0x2cd   :  { %v279_v16 = vadd.f32 %v488_v2, %v278_v15 }
 0x2cf   :  { %v295_v17 = vsel %vm290_vm3, %v279_v16, -3e+38 }
 0x2d0   :  { %307 = vmax.xlane.f32.xlu2 %v295_v17 }
 0x2d4   :  { %v280_v18 = vpop.f32.mrf.mxu3 }
 0x2d5   :  { %v281_v19 = vadd.f32 %v488_v2, %v280_v18 }
 0x2d7   :  { %v296_v20 = vsel %vm290_vm3, %v281_v19, -3e+38 }
 0x2d8   :  { %309 = vmax.xlane.f32.xlu2 %v296_v20 }
 0x2dc   :  { %v283_v21 = vpop.f32.mrf.mxu3 }
 0x2dd   :  { %v284_v22 = vadd.f32 %v488_v2, %v283_v21 }
 0x2df   :  { %v297_v23 = vsel %vm290_vm3, %v284_v22, -3e+38 }
 0x2e0   :  { %311 = vmax.xlane.f32.xlu0 %v297_v23 }
 0x2e4   :  { %v285_v24 = vpop.f32.mrf.mxu3 }
 0x2e5   :  { %v286_v25 = vadd.f32 %v488_v2, %v285_v24 }
 0x2e7   :  { %v298_v26 = vsel %vm290_vm3, %v286_v25, -3e+38 }
 0x2e8   :  { %313 = vmax.xlane.f32.xlu1 %v298_v26 }
 0x323   :  { %v300_v27 = vpop.xlane.xlu0 %299 }
 0x324   :  { %v315_v28 = vsub.f32 %v291_v5, %v300_v27 }
 0x326   :  { %v323_v29 = vmul.f32 1.442695, %v315_v28 }
 0x328   :  { %489 = vpow2.f32 %v323_v29 }
 0x32b   :  { %v302_v30 = vpop.xlane.xlu0 %301 }
 0x32c   :  { %v655_v31 = vsub.f32 %v292_v8, %v302_v30 }
 0x32e   :  { %v490_v32 = vpop.eup %489  ;;  %v325_v33 = vmul.f32 1.442695, %v655_v31 }
 0x32f   :  { %v339_v34 = vsel %vm290_vm3, %v490_v32, 0.0 }
 0x330   :  { %491 = vpow2.f32 %v325_v33  ;;  %347 = vadd.xlane.f32.xlu2 %v339_v34 }
 0x333   :  { %v304_v35 = vpop.xlane.xlu1 %303 }
 0x334   :  { %v660_v36 = vsub.f32 %v293_v11, %v304_v35 }
 0x336   :  { %v492_v37 = vpop.eup %491  ;;  %v327_v38 = vmul.f32 1.442695, %v660_v36 }
 0x337   :  { %v340_v39 = vsel %vm290_vm3, %v492_v37, 0.0 }
 0x338   :  { %493 = vpow2.f32 %v327_v38  ;;  %349 = vadd.xlane.f32.xlu0 %v340_v39 }
 0x33b   :  { %v306_v40 = vpop.xlane.xlu1 %305 }
 0x33c   :  { %v318_v41 = vsub.f32 %v294_v14, %v306_v40 }
 0x33e   :  { %v494_v42 = vpop.eup %493  ;;  %v329_v43 = vmul.f32 1.442695, %v318_v41 }
 0x33f   :  { %v341_v44 = vsel %vm290_vm3, %v494_v42, 0.0 }
 0x340   :  { %495 = vpow2.f32 %v329_v43  ;;  %351 = vadd.xlane.f32.xlu1 %v341_v44 }
 0x343   :  { %v308_v45 = vpop.xlane.xlu2 %307 }
 0x344   :  { %v319_v46 = vsub.f32 %v295_v17, %v308_v45 }
 0x346   :  { %v496_v47 = vpop.eup %495  ;;  %v331_v48 = vmul.f32 1.442695, %v319_v46 }
 0x347   :  { %v342_v49 = vsel %vm290_vm3, %v496_v47, 0.0 }
 0x348   :  { %497 = vpow2.f32 %v331_v48  ;;  %353 = vadd.xlane.f32.xlu2 %v342_v49 }
 0x34b   :  { %v310_v50 = vpop.xlane.xlu2 %309 }
 0x34c   :  { %v320_v51 = vsub.f32 %v296_v20, %v310_v50 }
 0x34e   :  { %v498_v52 = vpop.eup %497  ;;  %v333_v53 = vmul.f32 1.442695, %v320_v51 }
 0x34f   :  { %v343_v54 = vsel %vm290_vm3, %v498_v52, 0.0 }
 0x350   :  { %499 = vpow2.f32 %v333_v53  ;;  %355 = vadd.xlane.f32.xlu0 %v343_v54 }
 0x353   :  { %v312_v55 = vpop.xlane.xlu0 %311 }
 0x354   :  { %v321_v56 = vsub.f32 %v297_v23, %v312_v55 }
 0x356   :  { %v500_v57 = vpop.eup %499  ;;  %v335_v58 = vmul.f32 1.442695, %v321_v56 }
 0x357   :  { %v344_v59 = vsel %vm290_vm3, %v500_v57, 0.0 }
 0x358   :  { %501 = vpow2.f32 %v335_v58  ;;  %357 = vadd.xlane.f32.xlu1 %v344_v59 }
 0x35b   :  { %v314_v60 = vpop.xlane.xlu1 %313 }
 0x35c   :  { %v322_v61 = vsub.f32 %v298_v26, %v314_v60 }
 0x35e   :  { %v502_v62 = vpop.eup %501  ;;  %v337_v63 = vmul.f32 1.442695, %v322_v61 }
 0x35f   :  { %v345_v0 = vsel %vm290_vm3, %v502_v62, 0.0 }
 0x360   :  { %503 = vpow2.f32 %v337_v63  ;;  %359 = vadd.xlane.f32.xlu2 %v345_v0 }
 0x366   :  { %v504_v2 = vpop.eup %503 }
 0x367   :  { %v346_v3 = vsel %vm290_vm3, %v504_v2, 0.0 }
 0x368   :  { %361 = vadd.xlane.f32.xlu0 %v346_v3 }
 0x3a3   :  { %v348_v4 = vpop.xlane.xlu2 %347 }
 0x3a4   :  { %505 = vlog2.f32 %v348_v4 }
 0x3aa   :  { %v506_v5 = vpop.eup %505 }
 0x3ab   :  { %v364_v6 = vmul.f32 0.6931472, %v506_v5  ;;  %v350_v7 = vpop.xlane.xlu0 %349 }
 0x3ac   :  { %507 = vlog2.f32 %v350_v7 }
 0x3ad   :  { %v379_v8 = vsub.f32 %v315_v28, %v364_v6 }
 0x3af   :  { %387 = vst [vmem:[#allocation2] sm:$0xff] %v379_v8 }
 0x3b2   :  { %v508_v9 = vpop.eup %507 }
 0x3b3   :  { %v366_v10 = vmul.f32 0.6931472, %v508_v9  ;;  %v352_v11 = vpop.xlane.xlu1 %351 }
 0x3b4   :  { %509 = vlog2.f32 %v352_v11 }
 0x3b5   :  { %v380_v12 = vsub.f32 %v655_v31, %v366_v10 }
 0x3b7   :  { %388 = vst [vmem:[#allocation2 + $0x8] sm:$0xff] %v380_v12 }
 0x3ba   :  { %v510_v13 = vpop.eup %509 }
 0x3bb   :  { %v368_v14 = vmul.f32 0.6931472, %v510_v13  ;;  %v354_v1 = vpop.xlane.xlu2 %353 }
 0x3bc   :  { %511 = vlog2.f32 %v354_v1 }
 0x3bd   :  { %v381_v15 = vsub.f32 %v660_v36, %v368_v14 }
 0x3bf   :  { %389 = vst [vmem:[#allocation2 + $0x10] sm:$0xff] %v381_v15 }
 0x3c2   :  { %v512_v16 = vpop.eup %511 }
 0x3c3   :  { %v370_v17 = vmul.f32 0.6931472, %v512_v16  ;;  %v356_v18 = vpop.xlane.xlu0 %355 }
 0x3c4   :  { %513 = vlog2.f32 %v356_v18 }
 0x3c5   :  { %v382_v19 = vsub.f32 %v318_v41, %v370_v17 }
 0x3c7   :  { %390 = vst [vmem:[#allocation2 + $0x18] sm:$0xff] %v382_v19 }
 0x3ca   :  { %v514_v20 = vpop.eup %513 }
 0x3cb   :  { %v372_v21 = vmul.f32 0.6931472, %v514_v20  ;;  %v358_v22 = vpop.xlane.xlu1 %357 }
 0x3cc   :  { %515 = vlog2.f32 %v358_v22 }
 0x3cd   :  { %v383_v23 = vsub.f32 %v319_v46, %v372_v21 }
 0x3cf   :  { %391 = vst [vmem:[#allocation2 + $0x20] sm:$0xff] %v383_v23 }
 0x3d2   :  { %v516_v24 = vpop.eup %515 }
 0x3d3   :  { %v374_v25 = vmul.f32 0.6931472, %v516_v24  ;;  %v360_v26 = vpop.xlane.xlu2 %359 }
 0x3d4   :  { %517 = vlog2.f32 %v360_v26 }
 0x3d5   :  { %v384_v27 = vsub.f32 %v320_v51, %v374_v25 }
 0x3d7   :  { %392 = vst [vmem:[#allocation2 + $0x28] sm:$0xff] %v384_v27 }
 0x3da   :  { %v518_v28 = vpop.eup %517 }
 0x3db   :  { %v376_v29 = vmul.f32 0.6931472, %v518_v28  ;;  %v362_v30 = vpop.xlane.xlu0 %361 }
 0x3dc   :  { %519 = vlog2.f32 %v362_v30 }
 0x3dd   :  { %v385_v31 = vsub.f32 %v321_v56, %v376_v29 }
 0x3df   :  { %393 = vst [vmem:[#allocation2 + $0x30] sm:$0xff] %v385_v31 }
 0x3e2   :  { %v520_v32 = vpop.eup %519 }
 0x3e3   :  { %v378_v33 = vmul.f32 0.6931472, %v520_v32 }
 0x3e5   :  { %v386_v34 = vsub.f32 %v322_v61, %v378_v33 }
 0x3e7   :  { %394 = vst [vmem:[#allocation2 + $0x38] sm:$0xff] %v386_v34 }
 0x3e8   :  { %407 = dma.vmem_to_hbm [thread:$0]  %s400_s5, 1024, %s402_s21, [#allocation3], %s548_s22, %s548_s22, %s549_s23  }
 0x3e9   :  { %545 = dma.done.wait [#allocation3], 1024  }
 0x3ea   :  { %546 = vsyncadd [#allocation3], 4294966272 }
 0x3eb   :  { %412 = vsyncpa [#allocation3], 1 }

</bundles_post_ra>
